<compile_context>
chip_gen: v7x
topology: tpu7x:2x2x1
jax: 0.10.0
libtpu: 0.0.40
codegen_flags: <defaults>
</compile_context>

<pallas_src>
import functools

import jax
import jax.numpy as jnp
from jax.experimental import pallas as pl
from jax.experimental.pallas import tpu as pltpu


def _round_up(x, m):
    return ((x + m - 1) // m) * m


def _choose_pack(dim, dout, hidden, max_r=16, weight_cap_bytes=4 << 20):
    """Row-packing factor r: pack r windows per kernel row so that loads and
    (ideally) stores are lane-dense. Returns 1 when dim is already 128-dense
    or when block-diag weight replication would get too large."""
    if dim % 128 == 0:
        return 1
    dim_dense = None
    for r in range(2, max_r + 1):
        wbytes = 2 * r * r * (dim * hidden + hidden * dout)  # bf16 block-diag weights
        if wbytes > weight_cap_bytes:
            break
        if (r * dim) % 128 == 0:
            if dim_dense is None:
                dim_dense = r
            if (r * dout) % 128 == 0:
                return r          # loads AND stores lane-dense
    return dim_dense if dim_dense is not None else 1


def _vmem_footprint_bytes(rows, rdim, rhid, rdout, x_bytes, out_bytes):
    """Per-step VMEM footprint (double-buffered tiles + resident weights +
    in-kernel temporaries)."""
    act = 2 * rows * rdim * x_bytes                       # activation tiles (2 bufs)
    outb = 2 * rows * rdout * out_bytes                   # output tiles (2 bufs)
    wts = 2 * (rdim * rhid + rhid * rdout) * 2            # bf16 weights (2 bufs each)
    bias = 2 * (rhid + rdout) * 4                         # f32 biases (2 bufs each)
    tmp = rows * (rdim * 2 + rhid * (4 + 2) + rdout * 4)  # bf16 x, f32+bf16 h1, f32 out
    return act + outb + wts + bias + tmp


def _grouped_mlp_kernel(x_ref, w1_ref, b1_ref, w2_ref, b2_ref, o_ref):
    # x_ref:  (rows, r*dim)      activation tile (native dtype, r packed windows/row)
    # w1_ref: (r*dim, r*hidden)  bf16, per-head resident (block-diag if r > 1)
    # b1_ref: (1, r*hidden)      f32
    # w2_ref: (r*hidden, r*dout) bf16, per-head resident
    # b2_ref: (1, r*dout)        f32
    # o_ref:  (rows, r*dout)
    x = x_ref[...].astype(jnp.bfloat16)
    h1 = jnp.dot(x, w1_ref[...], preferred_element_type=jnp.float32)
    h1 = jnp.maximum(h1 + b1_ref[...], 0.0)               # bias + ReLU in f32
    out = jnp.dot(h1.astype(jnp.bfloat16), w2_ref[...],
                  preferred_element_type=jnp.float32)
    o_ref[...] = (out + b2_ref[...]).astype(o_ref.dtype)


@functools.partial(jax.jit, static_argnames=("max_tile_rows", "vmem_budget_mib"))
def grouped_mlp(kv, w1, b1, w2, b2, *, max_tile_rows=2048, vmem_budget_mib=24):
    """kv: (b, h, w, n, d) -> (b, h, w, d). Matches PyTorch GroupedMLP.forward.

    Output dtype follows kv's dtype (pass bf16 kv for bf16 end-to-end I/O; the
    kernel is HBM-bandwidth bound, so this halves wall-clock-dominant traffic).
    """
    b, h, w, n, d = kv.shape
    dim = n * d
    hidden = w1.shape[-1]
    dout = w2.shape[-1]
    assert w1.shape == (h, dim, hidden) and b1.shape == (h, hidden)
    assert w2.shape == (h, hidden, dout) and b2.shape == (h, dout)

    # 'b h w n d -> b h w (n d)' — contiguous, no data movement.
    x = kv.reshape(b, h, w, dim)

    # Lane packing factor (1 at production sizes where dim % 128 == 0).
    r = _choose_pack(dim, dout, hidden)
    rdim, rhid, rdout = r * dim, r * hidden, r * dout

    # --- tile the packed window axis (bounded padding + explicit VMEM budget).
    rows_needed = pl.cdiv(w, r)
    budget = vmem_budget_mib * 1024 * 1024
    x_bytes = kv.dtype.itemsize
    rows_cap = max(8, min(max_tile_rows, _round_up(rows_needed, 8)))
    while rows_cap > 8 and _vmem_footprint_bytes(
            rows_cap, rdim, rhid, rdout, x_bytes, x_bytes) > budget:
        rows_cap //= 2
    n_tiles = pl.cdiv(rows_needed, rows_cap)
    if n_tiles == 1:
        rows = rows_needed                       # full extent: no 8-row alignment needed
    else:
        rows = _round_up(pl.cdiv(rows_needed, n_tiles), 8)
        n_tiles = pl.cdiv(rows_needed, rows)
    w_pad = n_tiles * rows * r
    if w_pad != w:
        x = jnp.pad(x, ((0, 0), (0, 0), (0, w_pad - w), (0, 0)))
    # Pack r consecutive windows per row — contiguous reshape, free.
    xp = x.reshape(b, h, w_pad // r, rdim)

    # --- per-head weights: block-diagonal replication when r > 1; bf16 MXU
    # operands (tiny, stay VMEM-resident per head); biases stay f32.
    if r > 1:
        eye = jnp.eye(r, dtype=w1.dtype)
        w1p = jnp.einsum('ij,hkl->hikjl', eye, w1).reshape(h, rdim, rhid)
        w2p = jnp.einsum('ij,hkl->hikjl', eye, w2).reshape(h, rhid, rdout)
        b1p = jnp.tile(b1, (1, r))
        b2p = jnp.tile(b2, (1, r))
    else:
        w1p, w2p, b1p, b2p = w1, w2, b1, b2
    w1b = w1p.astype(jnp.bfloat16)
    w2b = w2p.astype(jnp.bfloat16)
    b1r = b1p.reshape(h, 1, rhid).astype(jnp.float32)
    b2r = b2p.reshape(h, 1, rdout).astype(jnp.float32)

    grid = (h, b, n_tiles)   # heads outermost -> weights VMEM-resident across (b, w)

    footprint = _vmem_footprint_bytes(rows, rdim, rhid, rdout, x_bytes, x_bytes)
    vmem_limit = int(min(max(2 * footprint, 32 * 1024 * 1024), 64 * 1024 * 1024))

    n_rows_total = b * h * (w_pad // r)
    flops = 2 * n_rows_total * (rdim * rhid + rhid * rdout)
    bytes_accessed = (xp.size * x_bytes
                      + n_rows_total * rdout * x_bytes
                      + w1b.size * 2 + w2b.size * 2
                      + b1r.size * 4 + b2r.size * 4)

    out_packed = pl.pallas_call(
        _grouped_mlp_kernel,
        out_shape=jax.ShapeDtypeStruct((b, h, w_pad // r, rdout), kv.dtype),
        grid_spec=pltpu.PrefetchScalarGridSpec(
            num_scalar_prefetch=0,
            grid=grid,
            in_specs=[
                # activation tile: depends on (b, w_tile) and head
                pl.BlockSpec((None, None, rows, rdim),
                             lambda hh, bb, ww: (bb, hh, ww, 0)),
                # per-head weights/biases: index_map depends only on the head
                pl.BlockSpec((None, rdim, rhid),
                             lambda hh, bb, ww: (hh, 0, 0)),
                pl.BlockSpec((None, 1, rhid),
                             lambda hh, bb, ww: (hh, 0, 0)),
                pl.BlockSpec((None, rhid, rdout),
                             lambda hh, bb, ww: (hh, 0, 0)),
                pl.BlockSpec((None, 1, rdout),
                             lambda hh, bb, ww: (hh, 0, 0)),
            ],
            out_specs=pl.BlockSpec((None, None, rows, rdout),
                                   lambda hh, bb, ww: (bb, hh, ww, 0)),
        ),
        compiler_params=pltpu.CompilerParams(
            dimension_semantics=("parallel", "parallel", "parallel"),
            vmem_limit_bytes=vmem_limit),
        cost_estimate=pl.CostEstimate(flops=flops, transcendentals=0,
                                      bytes_accessed=bytes_accessed),
    )(xp, w1b, b1r, w2b, b2r)

    # Unpack: (b, h, w_pad/r, r*dout) -> (b, h, w_pad, dout) is a free reshape.
    out = out_packed.reshape(b, h, w_pad, dout)
    if w_pad != w:
        out = out[:, :, :w, :]
    return out


def grouped_mlp_ref(kv, w1, b1, w2, b2):
    """Pure-JAX fp32 reference for correctness checking."""
    b, h, w, n, d = kv.shape
    x = kv.reshape(b, h, w, n * d).astype(jnp.float32)
    h1 = jnp.einsum('bhwi,hio->bhwo', x, w1.astype(jnp.float32)) \
        + b1.astype(jnp.float32)[None, :, None, :]
    h1 = jnp.maximum(h1, 0.0)
    out = jnp.einsum('bhwi,hio->bhwo', h1, w2.astype(jnp.float32)) \
        + b2.astype(jnp.float32)[None, :, None, :]
    return out


if __name__ == "__main__":
    # Module hyperparameters (small, consistent with GroupedMLP.__init__)
    dim_head = 16
    compress_window_size = 4
    heads = 2
    expand_factor = 1.0

    dim = dim_head * compress_window_size          # 64
    dim_hidden = int(dim * expand_factor)          # 64
    dim_out = dim_head                             # 16

    batch = 2
    num_windows = 10   # not a multiple of the pack factor -> exercises padding

    key = jax.random.PRNGKey(0)
    k_kv, k_w1, k_b1, k_w2, k_b2 = jax.random.split(key, 5)

    # bf16 activations end-to-end (mem-bound kernel -> halves HBM traffic).
    kv = jax.random.normal(
        k_kv, (batch, heads, num_windows, compress_window_size, dim_head),
        dtype=jnp.float32).astype(jnp.bfloat16)

    # Deterministic parameter init (synthetic, not a checkpoint load)
    w1 = jax.random.normal(k_w1, (heads, dim, dim_hidden), jnp.float32) * (dim ** -0.5)
    b1 = jax.random.normal(k_b1, (heads, dim_hidden), jnp.float32) * 0.01
    w2 = jax.random.normal(k_w2, (heads, dim_hidden, dim_out), jnp.float32) * (dim_hidden ** -0.5)
    b2 = jax.random.normal(k_b2, (heads, dim_out), jnp.float32) * 0.01

    out = grouped_mlp(kv, w1, b1, w2, b2)
    out = jax.block_until_ready(out)

    assert out.shape == (batch, heads, num_windows, dim_out), out.shape
    assert out.dtype == kv.dtype, out.dtype

    ref = grouped_mlp_ref(kv, w1, b1, w2, b2)
    # bf16 I/O + bf16 MXU operands with fp32 accumulation -> relaxed tolerance.
    max_err = float(jnp.max(jnp.abs(out.astype(jnp.float32) - ref)))
    assert jnp.allclose(out.astype(jnp.float32), ref, atol=7e-2, rtol=7e-2), (
        f"mismatch vs reference, max abs diff = {max_err}")

    print("KERNEL_OK")
</pallas_src>

<mosaic_0001>
module attributes {stable_mosaic.version = 11 : i64} {
  func.func @_grouped_mlp_kernel(%arg0: i32, %arg1: i32, %arg2: i32, %arg3: memref<1x1x2x512xbf16, #tpu.memory_space<vmem>>, %arg4: memref<1x512x512xbf16, #tpu.memory_space<vmem>>, %arg5: memref<1x1x512xf32, #tpu.memory_space<vmem>>, %arg6: memref<1x512x128xbf16, #tpu.memory_space<vmem>>, %arg7: memref<1x1x128xf32, #tpu.memory_space<vmem>>, %arg8: memref<1x1x2x128xbf16, #tpu.memory_space<vmem>>) attributes {dimension_semantics = [#tpu.dimension_semantics<parallel>, #tpu.dimension_semantics<parallel>, #tpu.dimension_semantics<parallel>], iteration_bounds = array<i64: 2, 2, 1>, scalar_prefetch = 0 : i64, scratch_operands = 0 : i64, tpu.core_type = #tpu.core_type<tc>, window_params = [{transform_indices = @transform_0, window_bounds = array<i64: 1, 1, 2, 512>}, {transform_indices = @transform_1, window_bounds = array<i64: 1, 512, 512>}, {transform_indices = @transform_2, window_bounds = array<i64: 1, 1, 512>}, {transform_indices = @transform_3, window_bounds = array<i64: 1, 512, 128>}, {transform_indices = @transform_4, window_bounds = array<i64: 1, 1, 128>}, {transform_indices = @transform_5, window_bounds = array<i64: 1, 1, 2, 128>}]} {
    %c0 = arith.constant 0 : index
    %c0_0 = arith.constant 0 : index
    %c0_1 = arith.constant 0 : index
    %c0_2 = arith.constant 0 : index
    %0 = vector.load %arg3[%c0, %c0_0, %c0_1, %c0_2] : memref<1x1x2x512xbf16, #tpu.memory_space<vmem>>, vector<1x1x2x512xbf16>
    %1 = vector.shape_cast %0 : vector<1x1x2x512xbf16> to vector<2x512xbf16>
    %c0_3 = arith.constant 0 : index
    %c0_4 = arith.constant 0 : index
    %c0_5 = arith.constant 0 : index
    %2 = vector.load %arg4[%c0_3, %c0_4, %c0_5] : memref<1x512x512xbf16, #tpu.memory_space<vmem>>, vector<1x512x512xbf16>
    %3 = vector.shape_cast %2 : vector<1x512x512xbf16> to vector<512x512xbf16>
    %cst = arith.constant dense<0.000000e+00> : vector<2x512xf32>
    %4 = tpu.matmul %1, %3, %cst {dimension_numbers = #tpu.dot_dimension_numbers<[1], [0], [0], [1], [0, 0, 1, 1], [], []>} : vector<2x512xbf16>, vector<512x512xbf16>, vector<2x512xf32> -> vector<2x512xf32>
    %c0_6 = arith.constant 0 : index
    %c0_7 = arith.constant 0 : index
    %c0_8 = arith.constant 0 : index
    %5 = vector.load %arg5[%c0_6, %c0_7, %c0_8] : memref<1x1x512xf32, #tpu.memory_space<vmem>>, vector<1x1x512xf32>
    %6 = vector.shape_cast %5 : vector<1x1x512xf32> to vector<1x512xf32>
    %7 = vector.broadcast %6 : vector<1x512xf32> to vector<2x512xf32>
    %8 = arith.addf %4, %7 : vector<2x512xf32>
    %cst_9 = arith.constant 0.000000e+00 : f32
    %9 = vector.broadcast %cst_9 : f32 to vector<2x512xf32>
    %10 = arith.maximumf %8, %9 : vector<2x512xf32>
    %11 = arith.truncf %10 : vector<2x512xf32> to vector<2x512xbf16>
    %c0_10 = arith.constant 0 : index
    %c0_11 = arith.constant 0 : index
    %c0_12 = arith.constant 0 : index
    %12 = vector.load %arg6[%c0_10, %c0_11, %c0_12] : memref<1x512x128xbf16, #tpu.memory_space<vmem>>, vector<1x512x128xbf16>
    %13 = vector.shape_cast %12 : vector<1x512x128xbf16> to vector<512x128xbf16>
    %cst_13 = arith.constant dense<0.000000e+00> : vector<2x128xf32>
    %14 = tpu.matmul %11, %13, %cst_13 {dimension_numbers = #tpu.dot_dimension_numbers<[1], [0], [0], [1], [0, 0, 1, 1], [], []>} : vector<2x512xbf16>, vector<512x128xbf16>, vector<2x128xf32> -> vector<2x128xf32>
    %c0_14 = arith.constant 0 : index
    %c0_15 = arith.constant 0 : index
    %c0_16 = arith.constant 0 : index
    %15 = vector.load %arg7[%c0_14, %c0_15, %c0_16] : memref<1x1x128xf32, #tpu.memory_space<vmem>>, vector<1x1x128xf32>
    %16 = vector.shape_cast %15 : vector<1x1x128xf32> to vector<1x128xf32>
    %17 = vector.broadcast %16 : vector<1x128xf32> to vector<2x128xf32>
    %18 = arith.addf %14, %17 : vector<2x128xf32>
    %19 = arith.truncf %18 : vector<2x128xf32> to vector<2x128xbf16>
    %c0_17 = arith.constant 0 : index
    %c0_18 = arith.constant 0 : index
    %c0_19 = arith.constant 0 : index
    %c0_20 = arith.constant 0 : index
    %20 = vector.load %arg8[%c0_17, %c0_18, %c0_19, %c0_20] : memref<1x1x2x128xbf16, #tpu.memory_space<vmem>>, vector<1x1x2x128xbf16>
    %21 = vector.shape_cast %20 : vector<1x1x2x128xbf16> to vector<2x128xbf16>
    %22 = vector.shape_cast %19 : vector<2x128xbf16> to vector<1x1x2x128xbf16>
    tpu.vector_store %arg8[%c0_17, %c0_18, %c0_19, %c0_20], %22 {strides = array<i32>} : memref<1x1x2x128xbf16, #tpu.memory_space<vmem>>, vector<1x1x2x128xbf16>,
    return
  }
  func.func @transform_0(%arg0: i32, %arg1: i32, %arg2: i32) -> (i32, i32, i32, i32) {
    %c0_i32 = arith.constant 0 : i32
    %c0_i32_0 = arith.constant 0 : i32
    return %arg1, %arg0, %arg2, %c0_i32 : i32, i32, i32, i32
  }
  func.func @transform_1(%arg0: i32, %arg1: i32, %arg2: i32) -> (i32, i32, i32) {
    %c0_i32 = arith.constant 0 : i32
    %c0_i32_0 = arith.constant 0 : i32
    %c0_i32_1 = arith.constant 0 : i32
    return %arg0, %c0_i32, %c0_i32_0 : i32, i32, i32
  }
  func.func @transform_2(%arg0: i32, %arg1: i32, %arg2: i32) -> (i32, i32, i32) {
    %c0_i32 = arith.constant 0 : i32
    %c0_i32_0 = arith.constant 0 : i32
    %c0_i32_1 = arith.constant 0 : i32
    return %arg0, %c0_i32, %c0_i32_0 : i32, i32, i32
  }
  func.func @transform_3(%arg0: i32, %arg1: i32, %arg2: i32) -> (i32, i32, i32) {
    %c0_i32 = arith.constant 0 : i32
    %c0_i32_0 = arith.constant 0 : i32
    %c0_i32_1 = arith.constant 0 : i32
    return %arg0, %c0_i32, %c0_i32_0 : i32, i32, i32
  }
  func.func @transform_4(%arg0: i32, %arg1: i32, %arg2: i32) -> (i32, i32, i32) {
    %c0_i32 = arith.constant 0 : i32
    %c0_i32_0 = arith.constant 0 : i32
    %c0_i32_1 = arith.constant 0 : i32
    return %arg0, %c0_i32, %c0_i32_0 : i32, i32, i32
  }
  func.func @transform_5(%arg0: i32, %arg1: i32, %arg2: i32) -> (i32, i32, i32, i32) {
    %c0_i32 = arith.constant 0 : i32
    %c0_i32_0 = arith.constant 0 : i32
    return %arg1, %arg0, %arg2, %c0_i32 : i32, i32, i32, i32
  }
}

</mosaic_0001>

<bundles_post_ra>
// kernel: grouped_mlp.1
= control target key start
LH: loop header
LB: loop body
LE: loop exit
PB: predicated region body
PF: predicated region fallthrough
CT: control target
= control target key end

     0   :  { %s2407_s18 = smov 0   ;;  %s2409_s19 = smov 0   ;;  %s2666_s0 = inlined_call_operand.vmem [shape: bf16[2,2,2,512], index: 0, kind: input, shape index: {}]   ;;  %s2667_s1 = inlined_call_operand.vmem [shape: bf16[2,512,512], index: 1, kind: input, shape index: {}]   ;;  %s2668_s2 = inlined_call_operand.vmem [shape: f32[2,1,512], index: 2, kind: input, shape index: {}]   ;;  %s2669_s3 = inlined_call_operand.vmem [shape: bf16[2,512,128], index: 3, kind: input, shape index: {}]   ;;  %s2670_s4 = inlined_call_operand.vmem [shape: f32[2,1,128], index: 4, kind: input, shape index: {}]   ;;  %s2671_s5 = inlined_call_operand.vmem [shape: bf16[2,2,2,128], index: 5, kind: output, shape index: {}]  }
   0x1   :  { %s2411_s20 = smov 0   ;;  %s2413_s21 = smov 0  }
   0x2   :  { %s2415_s22 = smov 0  }
   0x3 LB: > { %s30_s23 = sadd.s32 1, %s2366_s20  ;;  %s34_s24 = sadd.s32 1, %s2370_s21  ;;  %s2374_s22 = sphi %s2415_s22, %s15_s22   ;;  %s2370_s21 = sphi %s2413_s21, %s2675_s21   ;;  %s2366_s20 = sphi %s2411_s20, %s2674_s20   ;;  %s2362_s19 = sphi %s2409_s19, %s2673_s19   ;;  %s2358_s18 = sphi %s2407_s18, %s2672_s18  }
   0x4   : > { %p32_p0 = scmp.ge.s32.totalorder %s30_s23, 2  ;;  %p1840_p1 = scmp.ge.s32.totalorder %s2374_s22, 1 }
   0x5   : > { %p258_p2 = scmp.lt.s32.totalorder %s2374_s22, 5 }
   0x6   : > { %s2677_s23 = smov (%p32_p0, %s30_s23), 0  ;;  %s2679_s24 = smov (!%p32_p0, %s34_s24), %s2370_s21 }
   0x7   : > { %p259_p3 = pnand %p1840_p1, %p258_p2  ;;  %p36_p4 = scmp.ge.s32.totalorder %s2679_s24, 2 }
   0x8   : > { %p317_p5 = scmp.lt.s32.totalorder (!%p259_p3), %s2362_s19, 1  ;;  %p315_p6 = scmp.lt.s32.totalorder (!%p259_p3), %s2358_s18, 1  ;;  %v486_v38 = vlaneseq (!%p259_p3)  ;;  %v2376_v39 = vmov (!%p259_p3), 1966171168  }
   0x9   : > { %s2681_s24 = smov (%p36_p4, %s2679_s24), 0  ;;  %262 = sbr.rel (%p259_p3) target bundleno = 590 (0x24e), region = 40 }
   0xa   : > { %v516_v40 = vunpack.c.l.s4 (!%p259_p3), %v2376_v39  ;;  %v2497_v45 = vshrl.u32 (!%p259_p3), %v486_v38, 7 }
   0xc   : > { %v517_v46 = vunpack.c.0.s8 (!%p259_p3), %v516_v40 }
   0xe   : > { %v520_v51 = vsub.s32 (!%p259_p3), %v517_v46, %v2497_v45 }
  0x10   : > { %s2683_s19 = smov (!%p317_p5, %s2362_s19), 1  ;;  %s2685_s18 = smov (!%p315_p6, %s2358_s18), 1 }
  0x11   : > { %s2013_s25 = sshll.u32 %s2683_s19, 10  ;;  %s1841_s29 = sshll.u32 %s2683_s19, 2 }
  0x12   : > { %s2445_s28 = scalar_lea.vmem %s2667_s1, %s2013_s25  ;;  %s1842_s30 = sshll.u32 %s2685_s18, 3 }
  0x13   : > { %v2112_v0 = vld [vmem:[%s2445_s28 + $0x4] ss:$16 sps:$4 sm:$0xff]   ;;  %v2114_v1 = vld [vmem:[%s2445_s28 + $0xc] ss:$16 sps:$4 sm:$0xff]   ;;  %v2116_v2 = vld [vmem:[%s2445_s28] ss:$16 sps:$4 sm:$0xff]   ;;  %s325_s6 = sadd.s32 %s1842_s30, %s1841_s29  ;;  %s335_s16 = scalar_lea.vmem %s2668_s2, %s1841_s29 }
  0x14   : > { %1175 = vmatprep.subr.bf16.mxu0 %v2112_v0  ;;  %v2117_v3 = vld [vmem:[%s2445_s28 + $0x8] ss:$16 sps:$4 sm:$0xff]   ;;  %1257 = vmatprep.subr.bf16.mxu1 %v2114_v1  ;;  %v2118_v4 = vld [vmem:[%s2445_s28 + $0x24] ss:$16 sps:$4 sm:$0xff]   ;;  %v2120_v5 = vld [vmem:[%s2445_s28 + $0x2c] ss:$16 sps:$4 sm:$0xff]   ;;  %s326_s9 = scalar_lea.vmem %s2666_s0, %s325_s6  ;;  %s343_s26 = scalar_lea.vmem %s2670_s4, %s2683_s19 }
  0x15   : > { %1176 = vmatpush1.bf16.msra.mxu0 %v2116_v2  ;;  %1258 = vmatpush1.bf16.msra.mxu1 %v2117_v3  ;;  %v2122_v6 = vld [vmem:[%s2445_s28 + $0x20] ss:$16 sps:$4 sm:$0xff]   ;;  %v2123_v7 = vld [vmem:[%s2445_s28 + $0x28] ss:$16 sps:$4 sm:$0xff]   ;;  %v2124_v8 = vld [vmem:[%s2445_s28 + $0x44] ss:$16 sps:$4 sm:$0xff]  }
  0x16   : > { %1177 = vmatprep.subr.bf16.mxu0 %v2118_v4  ;;  %1259 = vmatprep.subr.bf16.mxu1 %v2120_v5  ;;  %v2126_v9 = vld [vmem:[%s2445_s28 + $0x4c] ss:$16 sps:$4 sm:$0xff]   ;;  %v2128_v10 = vld [vmem:[%s2445_s28 + $0x40] ss:$16 sps:$4 sm:$0xff]   ;;  %v2129_v11 = vld [vmem:[%s2445_s28 + $0x48] ss:$16 sps:$4 sm:$0xff]  }
  0x17   : > { %v2130_v12 = vld [vmem:[%s2445_s28 + $0x64] ss:$16 sps:$4 sm:$0xff]   ;;  %v2132_v13 = vld [vmem:[%s2445_s28 + $0x6c] ss:$16 sps:$4 sm:$0xff]   ;;  %v2134_v14 = vld [vmem:[%s2445_s28 + $0x60] ss:$16 sps:$4 sm:$0xff]  }
  0x18   : > { %v2135_v15 = vld [vmem:[%s2445_s28 + $0x68] ss:$16 sps:$4 sm:$0xff]   ;;  %v2136_v16 = vld [vmem:[%s2445_s28 + $0x84] ss:$16 sps:$4 sm:$0xff]   ;;  %v2138_v17 = vld [vmem:[%s2445_s28 + $0x8c] ss:$16 sps:$4 sm:$0xff]  }
  0x19   : > { %1178 = vmatpush1.bf16.msra.mxu0 %v2122_v6  ;;  %1260 = vmatpush1.bf16.msra.mxu1 %v2123_v7  ;;  %v2140_v18 = vld [vmem:[%s2445_s28 + $0x80] ss:$16 sps:$4 sm:$0xff]   ;;  %v2141_v19 = vld [vmem:[%s2445_s28 + $0x88] ss:$16 sps:$4 sm:$0xff]   ;;  %v2142_v20 = vld [vmem:[%s2445_s28 + $0xa4] ss:$16 sps:$4 sm:$0xff]  }
  0x1a   : > { %1179 = vmatprep.subr.bf16.mxu0 %v2124_v8  ;;  %1261 = vmatprep.subr.bf16.mxu1 %v2126_v9  ;;  %v2144_v21 = vld [vmem:[%s2445_s28 + $0xac] ss:$16 sps:$4 sm:$0xff]   ;;  %v2146_v22 = vld [vmem:[%s2445_s28 + $0xa0] ss:$16 sps:$4 sm:$0xff]   ;;  %v2147_v23 = vld [vmem:[%s2445_s28 + $0xa8] ss:$16 sps:$4 sm:$0xff]  }
  0x1b   : > { %v2148_v24 = vld [vmem:[%s2445_s28 + $0xc4] ss:$16 sps:$4 sm:$0xff]   ;;  %v2150_v25 = vld [vmem:[%s2445_s28 + $0xcc] ss:$16 sps:$4 sm:$0xff]   ;;  %v2152_v26 = vld [vmem:[%s2445_s28 + $0xc0] ss:$16 sps:$4 sm:$0xff]  }
  0x1c   : > { %v2153_v27 = vld [vmem:[%s2445_s28 + $0xc8] ss:$16 sps:$4 sm:$0xff]   ;;  %v2154_v28 = vld [vmem:[%s2445_s28 + $0xe4] ss:$16 sps:$4 sm:$0xff]   ;;  %v2156_v29 = vld [vmem:[%s2445_s28 + $0xec] ss:$16 sps:$4 sm:$0xff]  }
  0x1d   : > { %1180 = vmatpush1.bf16.msra.mxu0 %v2128_v10  ;;  %1262 = vmatpush1.bf16.msra.mxu1 %v2129_v11  ;;  %v2158_v30 = vld [vmem:[%s2445_s28 + $0xe0] ss:$16 sps:$4 sm:$0xff]   ;;  %v2159_v31 = vld [vmem:[%s2445_s28 + $0xe8] ss:$16 sps:$4 sm:$0xff]   ;;  %v2160_v32 = vld [vmem:[%s2445_s28 + $0x104] ss:$16 sps:$4 sm:$0xff]  }
  0x1e   : > { %1181 = vmatprep.subr.bf16.mxu0 %v2130_v12  ;;  %1263 = vmatprep.subr.bf16.mxu1 %v2132_v13  ;;  %v2162_v33 = vld [vmem:[%s2445_s28 + $0x10c] ss:$16 sps:$4 sm:$0xff]   ;;  %v2164_v34 = vld [vmem:[%s2445_s28 + $0x100] ss:$16 sps:$4 sm:$0xff]   ;;  %v2165_v35 = vld [vmem:[%s2445_s28 + $0x108] ss:$16 sps:$4 sm:$0xff]  }
  0x1f   : > { %v2166_v36 = vld [vmem:[%s2445_s28 + $0x124] ss:$16 sps:$4 sm:$0xff]   ;;  %v2168_v37 = vld [vmem:[%s2445_s28 + $0x12c] ss:$16 sps:$4 sm:$0xff]   ;;  %v2170_v41 = vld [vmem:[%s2445_s28 + $0x120] ss:$16 sps:$4 sm:$0xff]  }
  0x20   : > { %v2171_v42 = vld [vmem:[%s2445_s28 + $0x128] ss:$16 sps:$4 sm:$0xff]   ;;  %v2172_v43 = vld [vmem:[%s2445_s28 + $0x144] ss:$16 sps:$4 sm:$0xff]   ;;  %v2174_v44 = vld [vmem:[%s2445_s28 + $0x14c] ss:$16 sps:$4 sm:$0xff]  }
  0x21   : > { %1182 = vmatpush1.bf16.msra.mxu0 %v2134_v14  ;;  %1264 = vmatpush1.bf16.msra.mxu1 %v2135_v15  ;;  %v2176_v47 = vld [vmem:[%s2445_s28 + $0x140] ss:$16 sps:$4 sm:$0xff]   ;;  %v2177_v48 = vld [vmem:[%s2445_s28 + $0x148] ss:$16 sps:$4 sm:$0xff]   ;;  %v2178_v49 = vld [vmem:[%s2445_s28 + $0x164] ss:$16 sps:$4 sm:$0xff]  }
  0x22   : > { %1183 = vmatprep.subr.bf16.mxu0 %v2136_v16  ;;  %1265 = vmatprep.subr.bf16.mxu1 %v2138_v17  ;;  %v2180_v50 = vld [vmem:[%s2445_s28 + $0x16c] ss:$16 sps:$4 sm:$0xff]   ;;  %v1849_v52 = vld.sshfl [vmem:[%s326_s9] sm:$0x33 pattern:$0x75316420] }
  0x23   : > { %v2182_v53 = vld [vmem:[%s2445_s28 + $0x160] ss:$16 sps:$4 sm:$0xff]   ;;  %v2183_v54 = vld [vmem:[%s2445_s28 + $0x168] ss:$16 sps:$4 sm:$0xff]   ;;  %v514_v55 = vcombine.high %v1849_v52, %v1849_v52  ;;  %v2184_v56 = vld [vmem:[%s2445_s28 + $0x184] ss:$16 sps:$4 sm:$0xff]   ;;  %v2528_v12 = vrot.slane %v1849_v52, %v520_v51 }
  0x24   : > { %v2186_v57 = vld [vmem:[%s2445_s28 + $0x18c] ss:$16 sps:$4 sm:$0xff]   ;;  %v2188_v59 = vld [vmem:[%s2445_s28 + $0x180] ss:$16 sps:$4 sm:$0xff]   ;;  %v2189_v60 = vld [vmem:[%s2445_s28 + $0x188] ss:$16 sps:$4 sm:$0xff]  }
  0x25   : > { %1184 = vmatpush1.bf16.msra.mxu0 %v2140_v18  ;;  %1266 = vmatpush1.bf16.msra.mxu1 %v2141_v19  ;;  %v528_v58 = vrot.slane %v514_v55, %v520_v51  ;;  %v2190_v61 = vld [vmem:[%s2445_s28 + $0x1a4] ss:$16 sps:$4 sm:$0xff]   ;;  %v2192_v62 = vld [vmem:[%s2445_s28 + $0x1ac] ss:$16 sps:$4 sm:$0xff]   ;;  %v2194_v63 = vld [vmem:[%s2445_s28 + $0x1a0] ss:$16 sps:$4 sm:$0xff]  }
  0x26   : > { %1185 = vmatprep.subr.bf16.mxu0 %v2142_v20  ;;  %1267 = vmatprep.subr.bf16.mxu1 %v2144_v21  ;;  %v2195_v0 = vld [vmem:[%s2445_s28 + $0x1a8] ss:$16 sps:$4 sm:$0xff]   ;;  %v2196_v1 = vld [vmem:[%s2445_s28 + $0x1c4] ss:$16 sps:$4 sm:$0xff]   ;;  %v2198_v2 = vld [vmem:[%s2445_s28 + $0x1cc] ss:$16 sps:$4 sm:$0xff]  }
  0x27   : > { %1207 = vmatprep.mubr.bf16.mxu0 %v528_v58  ;;  %1289 = vmatprep.mubr.bf16.mxu1 %v528_v58  ;;  %v2200_v3 = vld [vmem:[%s2445_s28 + $0x1c0] ss:$16 sps:$4 sm:$0xff]   ;;  %v2201_v4 = vld [vmem:[%s2445_s28 + $0x1c8] ss:$16 sps:$4 sm:$0xff]   ;;  %v2202_v5 = vld [vmem:[%s2445_s28 + $0x1e4] ss:$16 sps:$4 sm:$0xff]   ;;  %v530_v16 = vcombine.high %v528_v58, %v528_v58 }
  0x28   : > { %v2204_v6 = vld [vmem:[%s2445_s28 + $0x1ec] ss:$16 sps:$4 sm:$0xff]   ;;  %v2206_v7 = vld [vmem:[%s2445_s28 + $0x1e0] ss:$16 sps:$4 sm:$0xff]   ;;  %v2207_v8 = vld [vmem:[%s2445_s28 + $0x1e8] ss:$16 sps:$4 sm:$0xff]  }
  0x29   : > { %1186 = vmatpush1.bf16.msra.mxu0 %v2146_v22  ;;  %1268 = vmatpush1.bf16.msra.mxu1 %v2147_v23  ;;  %v2210_v9 = vld [vmem:[%s2445_s28 + $0x204] ss:$16 sps:$4 sm:$0xff]   ;;  %v2213_v10 = vld [vmem:[%s2445_s28 + $0x20c] ss:$16 sps:$4 sm:$0xff]   ;;  %v2208_v11 = vld [vmem:[%s2445_s28 + $0x200] ss:$16 sps:$4 sm:$0xff]  }
  0x2a   : > { %1187 = vmatprep.subr.bf16.mxu0 %v2148_v24  ;;  %1269 = vmatprep.subr.bf16.mxu1 %v2150_v25  ;;  %v2211_v13 = vld [vmem:[%s2445_s28 + $0x208] ss:$16 sps:$4 sm:$0xff]   ;;  %v2216_v14 = vld [vmem:[%s2445_s28 + $0x224] ss:$16 sps:$4 sm:$0xff]   ;;  %v2219_v15 = vld [vmem:[%s2445_s28 + $0x22c] ss:$16 sps:$4 sm:$0xff]  }
  0x2b   : > { %v2214_v17 = vld [vmem:[%s2445_s28 + $0x220] ss:$16 sps:$4 sm:$0xff]   ;;  %v2217_v18 = vld [vmem:[%s2445_s28 + $0x228] ss:$16 sps:$4 sm:$0xff]   ;;  %v2222_v19 = vld [vmem:[%s2445_s28 + $0x244] ss:$16 sps:$4 sm:$0xff]  }
  0x2c   : > { %v2225_v20 = vld [vmem:[%s2445_s28 + $0x24c] ss:$16 sps:$4 sm:$0xff]   ;;  %v2220_v21 = vld [vmem:[%s2445_s28 + $0x240] ss:$16 sps:$4 sm:$0xff]   ;;  %v2223_v22 = vld [vmem:[%s2445_s28 + $0x248] ss:$16 sps:$4 sm:$0xff]  }
  0x2d   : > { %1188 = vmatpush1.bf16.msra.mxu0 %v2152_v26  ;;  %1270 = vmatpush1.bf16.msra.mxu1 %v2153_v27  ;;  %v2228_v23 = vld [vmem:[%s2445_s28 + $0x264] ss:$16 sps:$4 sm:$0xff]   ;;  %v2231_v24 = vld [vmem:[%s2445_s28 + $0x26c] ss:$16 sps:$4 sm:$0xff]   ;;  %v2226_v25 = vld [vmem:[%s2445_s28 + $0x260] ss:$16 sps:$4 sm:$0xff]  }
  0x2e   : > { %1189 = vmatprep.subr.bf16.mxu0 %v2154_v28  ;;  %1271 = vmatprep.subr.bf16.mxu1 %v2156_v29  ;;  %v2229_v26 = vld [vmem:[%s2445_s28 + $0x268] ss:$16 sps:$4 sm:$0xff]   ;;  %v2234_v27 = vld [vmem:[%s2445_s28 + $0x284] ss:$16 sps:$4 sm:$0xff]   ;;  %v2237_v28 = vld [vmem:[%s2445_s28 + $0x28c] ss:$16 sps:$4 sm:$0xff]  }
  0x2f   : > { %v2232_v29 = vld [vmem:[%s2445_s28 + $0x280] ss:$16 sps:$4 sm:$0xff]   ;;  %s2014_s10 = sshll.u32 %s2683_s19, 8  ;;  %v2247_v38 = vld [vmem:[%s2445_s28 + $0x2c8] ss:$16 sps:$4 sm:$0xff]   ;;  %s1848_s27 = sshll.u32 %s2685_s18, 1 }
  0x30   : > { %s2557_s13 = scalar_lea.vmem %s2669_s3, %s2014_s10  ;;  %v2252_v39 = vld [vmem:[%s2445_s28 + $0x2e4] ss:$16 sps:$4 sm:$0xff]   ;;  %v2255_v40 = vld [vmem:[%s2445_s28 + $0x2ec] ss:$16 sps:$4 sm:$0xff]   ;;  %v2256_v46 = vld [vmem:[%s2445_s28 + $0x300] ss:$16 sps:$4 sm:$0xff]  }
  0x31   : > { %1190 = vmatpush1.bf16.msra.mxu0 %v2158_v30  ;;  %1272 = vmatpush1.bf16.msra.mxu1 %v2159_v31  ;;  %v2235_v30 = vld [vmem:[%s2445_s28 + $0x288] ss:$16 sps:$4 sm:$0xff]   ;;  %v2240_v31 = vld [vmem:[%s2445_s28 + $0x2a4] ss:$16 sps:$4 sm:$0xff]   ;;  %v2274_v58 = vld [vmem:[%s2445_s28 + $0x360] ss:$16 sps:$4 sm:$0xff]  }
  0x32   : > { %1191 = vmatprep.subr.bf16.mxu0 %v2160_v32  ;;  %1273 = vmatprep.subr.bf16.mxu1 %v2162_v33  ;;  %v2243_v32 = vld [vmem:[%s2445_s28 + $0x2ac] ss:$16 sps:$4 sm:$0xff]   ;;  %v2238_v33 = vld [vmem:[%s2445_s28 + $0x2a0] ss:$16 sps:$4 sm:$0xff]   ;;  %v2265_v51 = vld [vmem:[%s2445_s28 + $0x328] ss:$16 sps:$4 sm:$0xff]  }
  0x33   : > { %v2270_v52 = vld [vmem:[%s2445_s28 + $0x344] ss:$16 sps:$4 sm:$0xff]   ;;  %v2271_v55 = vld [vmem:[%s2445_s28 + $0x348] ss:$16 sps:$4 sm:$0xff]  }
  0x35   : > { %1192 = vmatpush1.bf16.msra.mxu0 %v2164_v34  ;;  %1274 = vmatpush1.bf16.msra.mxu1 %v2165_v35  ;;  %v2241_v34 = vld [vmem:[%s2445_s28 + $0x2a8] ss:$16 sps:$4 sm:$0xff]   ;;  %v2246_v35 = vld [vmem:[%s2445_s28 + $0x2c4] ss:$16 sps:$4 sm:$0xff]  }
  0x36   : > { %1193 = vmatprep.subr.bf16.mxu0 %v2166_v36  ;;  %1275 = vmatprep.subr.bf16.mxu1 %v2168_v37  ;;  %v2249_v36 = vld [vmem:[%s2445_s28 + $0x2cc] ss:$16 sps:$4 sm:$0xff]   ;;  %v2244_v37 = vld [vmem:[%s2445_s28 + $0x2c0] ss:$16 sps:$4 sm:$0xff]  }
  0x39   : > { %1194 = vmatpush1.bf16.msra.mxu0 %v2170_v41  ;;  %1276 = vmatpush1.bf16.msra.mxu1 %v2171_v42  ;;  %v2250_v41 = vld [vmem:[%s2445_s28 + $0x2e0] ss:$16 sps:$4 sm:$0xff]   ;;  %v2253_v42 = vld [vmem:[%s2445_s28 + $0x2e8] ss:$16 sps:$4 sm:$0xff]  }
  0x3a   : > { %1195 = vmatprep.subr.bf16.mxu0 %v2172_v43  ;;  %1277 = vmatprep.subr.bf16.mxu1 %v2174_v44  ;;  %v2258_v43 = vld [vmem:[%s2445_s28 + $0x304] ss:$16 sps:$4 sm:$0xff]   ;;  %v2261_v44 = vld [vmem:[%s2445_s28 + $0x30c] ss:$16 sps:$4 sm:$0xff]  }
  0x3d   : > { %1196 = vmatpush1.bf16.msra.mxu0 %v2176_v47  ;;  %1278 = vmatpush1.bf16.msra.mxu1 %v2177_v48  ;;  %v2259_v47 = vld [vmem:[%s2445_s28 + $0x308] ss:$16 sps:$4 sm:$0xff]   ;;  %v2264_v48 = vld [vmem:[%s2445_s28 + $0x324] ss:$16 sps:$4 sm:$0xff]  }
  0x3e   : > { %1197 = vmatprep.subr.bf16.mxu0 %v2178_v49  ;;  %1279 = vmatprep.subr.bf16.mxu1 %v2180_v50  ;;  %v2267_v49 = vld [vmem:[%s2445_s28 + $0x32c] ss:$16 sps:$4 sm:$0xff]   ;;  %v2262_v50 = vld [vmem:[%s2445_s28 + $0x320] ss:$16 sps:$4 sm:$0xff]  }
  0x41   : > { %1198 = vmatpush1.bf16.msra.mxu0 %v2182_v53  ;;  %1280 = vmatpush1.bf16.msra.mxu1 %v2183_v54  ;;  %v2273_v53 = vld [vmem:[%s2445_s28 + $0x34c] ss:$16 sps:$4 sm:$0xff]   ;;  %v2268_v54 = vld [vmem:[%s2445_s28 + $0x340] ss:$16 sps:$4 sm:$0xff]  }
  0x42   : > { %1199 = vmatprep.subr.bf16.mxu0 %v2184_v56  ;;  %1281 = vmatprep.subr.bf16.mxu1 %v2186_v57  ;;  %v2276_v56 = vld [vmem:[%s2445_s28 + $0x364] ss:$16 sps:$4 sm:$0xff]   ;;  %v2279_v57 = vld [vmem:[%s2445_s28 + $0x36c] ss:$16 sps:$4 sm:$0xff]  }
  0x45   : > { %1200 = vmatpush1.bf16.msra.mxu0 %v2188_v59  ;;  %1282 = vmatpush1.bf16.msra.mxu1 %v2189_v60  ;;  %v2277_v59 = vld [vmem:[%s2445_s28 + $0x368] ss:$16 sps:$4 sm:$0xff]   ;;  %v2282_v60 = vld [vmem:[%s2445_s28 + $0x384] ss:$16 sps:$4 sm:$0xff]  }
  0x46   : > { %1201 = vmatprep.subr.bf16.mxu0 %v2190_v61  ;;  %1283 = vmatprep.subr.bf16.mxu1 %v2192_v62  ;;  %v2285_v61 = vld [vmem:[%s2445_s28 + $0x38c] ss:$16 sps:$4 sm:$0xff]   ;;  %v2280_v62 = vld [vmem:[%s2445_s28 + $0x380] ss:$16 sps:$4 sm:$0xff]  }
  0x49   : > { %1202 = vmatpush1.bf16.msra.mxu0 %v2194_v63  ;;  %1284 = vmatpush1.bf16.msra.mxu1 %v2195_v0  ;;  %v2283_v63 = vld [vmem:[%s2445_s28 + $0x388] ss:$16 sps:$4 sm:$0xff]   ;;  %v2288_v0 = vld [vmem:[%s2445_s28 + $0x3a4] ss:$16 sps:$4 sm:$0xff]  }
  0x4a   : > { %1203 = vmatprep.subr.bf16.mxu0 %v2196_v1  ;;  %1285 = vmatprep.subr.bf16.mxu1 %v2198_v2  ;;  %v2291_v1 = vld [vmem:[%s2445_s28 + $0x3ac] ss:$16 sps:$4 sm:$0xff]   ;;  %v2286_v2 = vld [vmem:[%s2445_s28 + $0x3a0] ss:$16 sps:$4 sm:$0xff]  }
  0x4d   : > { %1204 = vmatpush1.bf16.msra.mxu0 %v2200_v3  ;;  %1286 = vmatpush1.bf16.msra.mxu1 %v2201_v4  ;;  %v2289_v3 = vld [vmem:[%s2445_s28 + $0x3a8] ss:$16 sps:$4 sm:$0xff]   ;;  %v2294_v4 = vld [vmem:[%s2445_s28 + $0x3c4] ss:$16 sps:$4 sm:$0xff]  }
  0x4e   : > { %1205 = vmatprep.subr.bf16.mxu0 %v2202_v5  ;;  %1287 = vmatprep.subr.bf16.mxu1 %v2204_v6  ;;  %v2297_v5 = vld [vmem:[%s2445_s28 + $0x3cc] ss:$16 sps:$4 sm:$0xff]   ;;  %v2292_v6 = vld [vmem:[%s2445_s28 + $0x3c0] ss:$16 sps:$4 sm:$0xff]  }
  0x51   : > { %1206 = vmatpush1.bf16.msra.mxu0 %v2206_v7  ;;  %1288 = vmatpush1.bf16.msra.mxu1 %v2207_v8  ;;  %v2295_v7 = vld [vmem:[%s2445_s28 + $0x3c8] ss:$16 sps:$4 sm:$0xff]   ;;  %v2300_v8 = vld [vmem:[%s2445_s28 + $0x3e4] ss:$16 sps:$4 sm:$0xff]  }
  0x52   : > { %1216 = vmatprep.subr.bf16.mxu0 %v2210_v9  ;;  %1298 = vmatprep.subr.bf16.mxu1 %v2213_v10  ;;  %v2303_v9 = vld [vmem:[%s2445_s28 + $0x3ec] ss:$16 sps:$4 sm:$0xff]   ;;  %v2298_v10 = vld [vmem:[%s2445_s28 + $0x3e0] ss:$16 sps:$4 sm:$0xff]  }
  0x54   : > { %1208 = vmatmul.mubr.bf16.vlgmr.msra.gmra.mrb[0].mxu0 %v2528_v12  ;;  %1290 = vmatmul.mubr.bf16.vlgmr.msra.gmra.mrb[0].mxu1 %v2528_v12 }
  0x55   : > { %1217 = vmatpush1.bf16.msra.mxu0 %v2208_v11  ;;  %1299 = vmatpush1.bf16.msra.mxu1 %v2211_v13  ;;  %v2301_v11 = vld [vmem:[%s2445_s28 + $0x3e8] ss:$16 sps:$4 sm:$0xff]   ;;  %v2304_v13 = vld [vmem:[%s2557_s13 + $0x40] sm:$0xff]   ;;  %s352_s28 = sadd.s32 %s1848_s27, %s2683_s19 }
  0x56   : > { %1218 = vmatprep.subr.bf16.mxu0 %v2216_v14  ;;  %1300 = vmatprep.subr.bf16.mxu1 %v2219_v15  ;;  %v2305_v14 = vld [vmem:[%s2557_s13 + $0xc0] sm:$0xff]   ;;  %v529_v15 = vcombine.high %v2528_v12, %v2528_v12  ;;  %v2311_v12 = vld [vmem:[%s2557_s13 + $0x88] sm:$0xff]   ;;  %s353_s6 = scalar_lea.vmem %s2671_s5, %s352_s28 }
  0x57   : > { %1248 = vmatprep.mubr.bf16.mxu0 %v530_v16  ;;  %1330 = vmatprep.mubr.bf16.mxu1 %v530_v16  ;;  %v2306_v16 = vld [vmem:[%s2557_s13] sm:$0xff]  }
  0x59   : > { %1219 = vmatpush1.bf16.msra.mxu0 %v2214_v17  ;;  %1301 = vmatpush1.bf16.msra.mxu1 %v2217_v18  ;;  %v2307_v17 = vld [vmem:[%s2557_s13 + $0x80] sm:$0xff]   ;;  %v2308_v18 = vld [vmem:[%s2557_s13 + $0x48] sm:$0xff]  }
  0x5a   : > { %1220 = vmatprep.subr.bf16.mxu0 %v2222_v19  ;;  %1302 = vmatprep.subr.bf16.mxu1 %v2225_v20  ;;  %v2309_v19 = vld [vmem:[%s2557_s13 + $0xc8] sm:$0xff]  }
  0x5b   : > { %v2310_v20 = vld [vmem:[%s2557_s13 + $0x8] sm:$0xff]  }
  0x5d   : > { %1221 = vmatpush1.bf16.msra.mxu0 %v2220_v21  ;;  %1303 = vmatpush1.bf16.msra.mxu1 %v2223_v22  ;;  %v2312_v21 = vld [vmem:[%s2557_s13 + $0x50] sm:$0xff]  }
  0x5e   : > { %1222 = vmatprep.subr.bf16.mxu0 %v2228_v23  ;;  %1304 = vmatprep.subr.bf16.mxu1 %v2231_v24  ;;  %v2313_v22 = vld [vmem:[%s2557_s13 + $0xd0] sm:$0xff]  }
  0x5f   : > { %v2314_v23 = vld [vmem:[%s2557_s13 + $0x10] sm:$0xff]  }
  0x60   : > { %v2315_v24 = vld [vmem:[%s2557_s13 + $0x90] sm:$0xff]  }
  0x61   : > { %1223 = vmatpush1.bf16.msra.mxu0 %v2226_v25  ;;  %1305 = vmatpush1.bf16.msra.mxu1 %v2229_v26  ;;  %v2316_v25 = vld [vmem:[%s2557_s13 + $0x58] sm:$0xff]  }
  0x62   : > { %1224 = vmatprep.subr.bf16.mxu0 %v2234_v27  ;;  %1306 = vmatprep.subr.bf16.mxu1 %v2237_v28  ;;  %v2317_v26 = vld [vmem:[%s2557_s13 + $0xd8] sm:$0xff]  }
  0x63   : > { %v2318_v27 = vld [vmem:[%s2557_s13 + $0x18] sm:$0xff]  }
  0x64   : > { %v2319_v28 = vld [vmem:[%s2557_s13 + $0x98] sm:$0xff]  }
  0x65   : > { %1225 = vmatpush1.bf16.msra.mxu0 %v2232_v29  ;;  %1307 = vmatpush1.bf16.msra.mxu1 %v2235_v30  ;;  %v2320_v29 = vld [vmem:[%s2557_s13 + $0x60] sm:$0xff]  }
  0x66   : > { %1226 = vmatprep.subr.bf16.mxu0 %v2240_v31  ;;  %1308 = vmatprep.subr.bf16.mxu1 %v2243_v32  ;;  %v2321_v30 = vld [vmem:[%s2557_s13 + $0xe0] sm:$0xff]  }
  0x67   : > { %v2322_v31 = vld [vmem:[%s2557_s13 + $0x20] sm:$0xff]  }
  0x68   : > { %v2323_v32 = vld [vmem:[%s2557_s13 + $0xa0] sm:$0xff]  }
  0x69   : > { %1227 = vmatpush1.bf16.msra.mxu0 %v2238_v33  ;;  %1309 = vmatpush1.bf16.msra.mxu1 %v2241_v34  ;;  %v2324_v33 = vld [vmem:[%s2557_s13 + $0x68] sm:$0xff]  }
  0x6a   : > { %1228 = vmatprep.subr.bf16.mxu0 %v2246_v35  ;;  %1310 = vmatprep.subr.bf16.mxu1 %v2249_v36  ;;  %v2325_v34 = vld [vmem:[%s2557_s13 + $0xe8] sm:$0xff]  }
  0x6b   : > { %v2326_v35 = vld [vmem:[%s2557_s13 + $0x28] sm:$0xff]  }
  0x6c   : > { %v2327_v36 = vld [vmem:[%s2557_s13 + $0xa8] sm:$0xff]  }
  0x6d   : > { %1229 = vmatpush1.bf16.msra.mxu0 %v2244_v37  ;;  %1311 = vmatpush1.bf16.msra.mxu1 %v2247_v38  ;;  %v2328_v37 = vld [vmem:[%s2557_s13 + $0x70] sm:$0xff]  }
  0x6e   : > { %1230 = vmatprep.subr.bf16.mxu0 %v2252_v39  ;;  %1312 = vmatprep.subr.bf16.mxu1 %v2255_v40  ;;  %v2329_v38 = vld [vmem:[%s2557_s13 + $0xf0] sm:$0xff]  }
  0x6f   : > { %v2330_v39 = vld [vmem:[%s2557_s13 + $0x30] sm:$0xff]  }
  0x70   : > { %v2331_v40 = vld [vmem:[%s2557_s13 + $0xb0] sm:$0xff]  }
  0x71   : > { %1231 = vmatpush1.bf16.msra.mxu0 %v2250_v41  ;;  %1313 = vmatpush1.bf16.msra.mxu1 %v2253_v42  ;;  %v2332_v41 = vld [vmem:[%s2557_s13 + $0x78] sm:$0xff]  }
  0x72   : > { %1232 = vmatprep.subr.bf16.mxu0 %v2258_v43  ;;  %1314 = vmatprep.subr.bf16.mxu1 %v2261_v44  ;;  %v2333_v42 = vld [vmem:[%s2557_s13 + $0xf8] sm:$0xff]  }
  0x73   : > { %v2334_v43 = vld [vmem:[%s2557_s13 + $0x38] sm:$0xff]  }
  0x74   : > { %v2335_v44 = vld [vmem:[%s2557_s13 + $0xb8] sm:$0xff]  }
  0x75   : > { %1233 = vmatpush1.bf16.msra.mxu0 %v2256_v46  ;;  %1315 = vmatpush1.bf16.msra.mxu1 %v2259_v47  ;;  %v488_v46 = vsub.s32 0, %v2497_v45  ;;  %v496_v47 = vsub.s32 2, %v2497_v45 }
  0x76   : > { %1234 = vmatprep.subr.bf16.mxu0 %v2264_v48  ;;  %1316 = vmatprep.subr.bf16.mxu1 %v2267_v49  ;;  %v484_v48 = vld [vmem:[%s335_s16] sm:$0xf]  ;;  %v492_v49 = vsub.s32 1, %v2497_v45 }
  0x79   : > { %1235 = vmatpush1.bf16.msra.mxu0 %v2262_v50  ;;  %1317 = vmatpush1.bf16.msra.mxu1 %v2265_v51  ;;  %v500_v50 = vsub.s32 3, %v2497_v45  ;;  %v489_v51 = vrot.slane %v484_v48, %v488_v46 }
  0x7a   : > { %1236 = vmatprep.subr.bf16.mxu0 %v2270_v52  ;;  %1318 = vmatprep.subr.bf16.mxu1 %v2273_v53  ;;  %v497_v52 = vrot.slane %v484_v48, %v496_v47  ;;  %v493_v53 = vrot.slane %v484_v48, %v492_v49 }
  0x7d   : > { %1237 = vmatpush1.bf16.msra.mxu0 %v2268_v54  ;;  %1319 = vmatpush1.bf16.msra.mxu1 %v2271_v55  ;;  %v501_v54 = vrot.slane %v484_v48, %v500_v50 }
  0x7e   : > { %1238 = vmatprep.subr.bf16.mxu0 %v2276_v56  ;;  %1320 = vmatprep.subr.bf16.mxu1 %v2279_v57 }
  0x81   : > { %1239 = vmatpush1.bf16.msra.mxu0 %v2274_v58  ;;  %1321 = vmatpush1.bf16.msra.mxu1 %v2277_v59 }
  0x82   : > { %1240 = vmatprep.subr.bf16.mxu0 %v2282_v60  ;;  %1322 = vmatprep.subr.bf16.mxu1 %v2285_v61 }
  0x85   : > { %1241 = vmatpush1.bf16.msra.mxu0 %v2280_v62  ;;  %1323 = vmatpush1.bf16.msra.mxu1 %v2283_v63 }
  0x86   : > { %1242 = vmatprep.subr.bf16.mxu0 %v2288_v0  ;;  %1324 = vmatprep.subr.bf16.mxu1 %v2291_v1 }
  0x89   : > { %1243 = vmatpush1.bf16.msra.mxu0 %v2286_v2  ;;  %1325 = vmatpush1.bf16.msra.mxu1 %v2289_v3 }
  0x8a   : > { %1244 = vmatprep.subr.bf16.mxu0 %v2294_v4  ;;  %1326 = vmatprep.subr.bf16.mxu1 %v2297_v5 }
  0x8d   : > { %1245 = vmatpush1.bf16.msra.mxu0 %v2292_v6  ;;  %1327 = vmatpush1.bf16.msra.mxu1 %v2295_v7 }
  0x8e   : > { %1246 = vmatprep.subr.bf16.mxu0 %v2300_v8  ;;  %1328 = vmatprep.subr.bf16.mxu1 %v2303_v9 }
  0x91   : > { %1247 = vmatpush1.bf16.msra.mxu0 %v2298_v10  ;;  %1329 = vmatpush1.bf16.msra.mxu1 %v2301_v11 }
  0x92   : > { %2015 = vmatprep.subr.bf16.mxu0 %v2304_v13  ;;  %2037 = vmatprep.subr.bf16.mxu1 %v2305_v14  ;;  %v1978_v13 = vld [vmem:[%s343_s26] ss:$0 sm:$0xff] }
  0x94   : > { %1249 = vmatmul.mubr.bf16.vlgmr.msra.gmra.mrb[0].mxu0 %v529_v15  ;;  %1331 = vmatmul.mubr.bf16.vlgmr.msra.gmra.mrb[0].mxu1 %v529_v15 }
  0x95   : > { %2016 = vmatpush3.bf16.msra.mxu0 %v2306_v16  ;;  %2038 = vmatpush3.bf16.msra.mxu1 %v2307_v17 }
  0x96   : > { %2017 = vmatprep.subr.bf16.mxu0 %v2308_v18  ;;  %2039 = vmatprep.subr.bf16.mxu1 %v2309_v19 }
  0x99   : > { %2018 = vmatpush3.bf16.msra.mxu0 %v2310_v20  ;;  %2040 = vmatpush3.bf16.msra.mxu1 %v2311_v12 }
  0x9a   : > { %2019 = vmatprep.subr.bf16.mxu0 %v2312_v21  ;;  %2041 = vmatprep.subr.bf16.mxu1 %v2313_v22 }
  0x9d   : > { %2020 = vmatpush3.bf16.msra.mxu0 %v2314_v23  ;;  %2042 = vmatpush3.bf16.msra.mxu1 %v2315_v24 }
  0x9e   : > { %2021 = vmatprep.subr.bf16.mxu0 %v2316_v25  ;;  %2043 = vmatprep.subr.bf16.mxu1 %v2317_v26 }
  0xa1   : > { %2022 = vmatpush3.bf16.msra.mxu0 %v2318_v27  ;;  %2044 = vmatpush3.bf16.msra.mxu1 %v2319_v28 }
  0xa2   : > { %2023 = vmatprep.subr.bf16.mxu0 %v2320_v29  ;;  %2045 = vmatprep.subr.bf16.mxu1 %v2321_v30 }
  0xa5   : > { %2024 = vmatpush3.bf16.msra.mxu0 %v2322_v31  ;;  %2046 = vmatpush3.bf16.msra.mxu1 %v2323_v32 }
  0xa6   : > { %2025 = vmatprep.subr.bf16.mxu0 %v2324_v33  ;;  %2047 = vmatprep.subr.bf16.mxu1 %v2325_v34 }
  0xa9   : > { %2026 = vmatpush3.bf16.msra.mxu0 %v2326_v35  ;;  %2048 = vmatpush3.bf16.msra.mxu1 %v2327_v36 }
  0xaa   : > { %2027 = vmatprep.subr.bf16.mxu0 %v2328_v37  ;;  %2049 = vmatprep.subr.bf16.mxu1 %v2329_v38 }
  0xad   : > { %2028 = vmatpush3.bf16.msra.mxu0 %v2330_v39  ;;  %2050 = vmatpush3.bf16.msra.mxu1 %v2331_v40 }
  0xae   : > { %2029 = vmatprep.subr.bf16.mxu0 %v2332_v41  ;;  %2051 = vmatprep.subr.bf16.mxu1 %v2333_v42 }
  0xb1   : > { %2030 = vmatpush3.bf16.msra.mxu0 %v2334_v43  ;;  %2052 = vmatpush3.bf16.msra.mxu1 %v2335_v44 }
 0x167   : > { %v1250_v55 = vpop.f32.mrb[0].mxu0  ;;  %v1332_v56 = vpop.f32.mrb[0].mxu1 }
 0x168   : > { %v2059_v57 = vadd.f32 %v1250_v55, %v489_v51  ;;  %v2061_v58 = vadd.f32 %v1332_v56, %v497_v52  ;;  %v1252_v59 = vpop.f32.mrb[1].mxu0  ;;  %v1334_v60 = vpop.f32.mrb[1].mxu1 }
 0x169   : > { %v2060_v61 = vadd.f32 %v1252_v59, %v493_v53  ;;  %v2062_v62 = vadd.f32 %v1334_v60, %v501_v54  ;;  %v1254_v63 = vpop.f32.mrb[2].mxu0  ;;  %v1336_v0 = vpop.f32.mrb[2].mxu1 }
 0x16a   : > { %v1339_v1 = vmax.f32 %v2059_v57, 0.0  ;;  %v1341_v2 = vmax.f32 %v2061_v58, 0.0  ;;  %v1255_v3 = vpop.f32.mrb[3].mxu0  ;;  %v1337_v4 = vpop.f32.mrb[3].mxu1 }
 0x16b   : > { %v1340_v45 = vmax.f32 %v2060_v61, 0.0  ;;  %v1342_v5 = vmax.f32 %v2062_v62, 0.0 }
 0x16c   : > { %v1343_v8 = vpack.c.bf16 %v1339_v1, %v1339_v1  ;;  %v1345_v9 = vpack.c.bf16 %v1341_v2, %v1341_v2 }
 0x16d   : > { %v1344_v6 = vpack.c.bf16 %v1340_v45, %v1340_v45  ;;  %v1346_v7 = vpack.c.bf16 %v1342_v5, %v1342_v5 }
 0x16f   : > { %1642 = vmatprep.mubr.bf16.mxu0 %v1344_v6  ;;  %1682 = vmatprep.mubr.bf16.mxu1 %v1346_v7 }
 0x170   : > { %1643 = vmatmul.mubr.bf16.vlgmr.msra.gmra.mrb[4].mxu0 %v1343_v8  ;;  %1683 = vmatmul.mubr.bf16.vlgmr.msra.gmra.mrb[4].mxu1 %v1345_v9 }
 0x243   : > { %v2031_v10 = vpop.f32.mrb[4].mxu0  ;;  %v2053_v11 = vpop.f32.mrb[4].mxu1 }
 0x244   : > { %v2032_v14 = vpop.f32.mrb[5].mxu0  ;;  %v2054_v15 = vpop.f32.mrb[5].mxu1 }
 0x245   : > { %v2033_v16 = vadd.f32 %v2032_v14, %v2031_v10  ;;  %v2055_v17 = vadd.f32 %v2054_v15, %v2053_v11  ;;  %v2034_v18 = vpop.f32.mrb[6].mxu0  ;;  %v2056_v19 = vpop.f32.mrb[6].mxu1 }
 0x246   : > { %v2035_v20 = vpop.f32.mrb[7].mxu0  ;;  %v2057_v12 = vpop.f32.mrb[7].mxu1 }
 0x247   : > { %v1645_v21 = vadd.f32 %v2033_v16, %v1978_v13 }
 0x249   : > { %v1685_v22 = vadd.f32 %v2055_v17, %v1645_v21 }
 0x24b   : > { %v1690_v23 = vpack.c.bf16 %v1685_v22, %v1685_v22 }
 0x24d   : > { %1691 = vst [vmem:[%s353_s6] sm:$0x1] %v1690_v23 }
 0x24e PF: > { %s15_s22 = sadd.s32 1, %s2374_s22   ;;  %s2672_s18 = smov %s2366_s20 }
 0x24f   : > { %p12_p7 = scmp.ge.s32.totalorder %s15_s22, 6   ;;  %s2673_s19 = smov %s2370_s21 }
 0x250   : > { %s2674_s20 = smov %s2677_s23  ;;  %s2675_s21 = smov %s2681_s24 }
 0x251   :  { %14 = sbr.rel (!%p12_p7) target bundleno = 3 (0x3), region = 82 }

</bundles_post_ra>
